<compile_context>
chip_gen: v5e
topology: v5e:2x2
jax: 0.10.0
libtpu: 0.0.40
codegen_flags: <defaults>
</compile_context>

<pallas_src>
import functools

import jax
import jax.numpy as jnp
from jax import lax
from jax.experimental import pallas as pl
from jax.experimental.pallas import tpu as pltpu


def _ce_partial_kernel(logits_ref, tgt_ref, out_ref, acc_ref, *, hw, n_b):
    """One grid step: (tb, C, T) logits + (tb, 1, T) int targets -> partial sum.

    Grid is (batch_blocks, spatial_tiles); the accumulator lives across the
    (inner, "arbitrary") spatial axis only, so the batch axis can be
    "parallel" (megacore / dual-TC safe).
    """
    i = pl.program_id(0)
    j = pl.program_id(1)
    nj = pl.num_programs(1)

    tb, n_cls, t_hw = logits_ref.shape

    @pl.when(j == 0)
    def _():
        acc_ref[...] = jnp.zeros_like(acc_ref)

    t = tgt_ref[:, 0, :].astype(jnp.int32)                      # (tb, T)

    # Pass 1: running max over classes + target-logit pick.
    # Unrolled over the (small, static) class count; every temporary is a
    # single (tb, T) row, never a (C, T) tile.
    x0 = logits_ref[:, 0, :].astype(jnp.float32)
    m = x0
    picked = jnp.where(t == 0, x0, 0.0)
    for c in range(1, n_cls):
        xc = logits_ref[:, c, :].astype(jnp.float32)
        m = jnp.maximum(m, xc)
        picked = picked + jnp.where(t == c, xc, 0.0)

    # Pass 2: sum of exp(x - m) over classes (rows re-read from VMEM: cheap).
    s = jnp.zeros_like(m)
    for c in range(n_cls):
        s = s + jnp.exp(logits_ref[:, c, :].astype(jnp.float32) - m)

    per_elem = m + jnp.log(s) - picked                          # (tb, T)

    # Batch-tail rows only exist when B % tb != 0 (static check -> no-op
    # otherwise).  Garbage rows (NaN/Inf) are zeroed before accumulation.
    if n_b % tb != 0:
        row = i * tb + lax.broadcasted_iota(jnp.int32, per_elem.shape, 0)
        per_elem = jnp.where(row < n_b, per_elem, 0.0)

    # Spatial tail: mask only on the last spatial tile; plain accumulate on
    # every other step (saves the iota/compare/select on non-tail steps).
    if hw % t_hw != 0:
        @pl.when(j == nj - 1)
        def _():
            col = j * t_hw + lax.broadcasted_iota(jnp.int32, per_elem.shape, 1)
            acc_ref[...] += jnp.where(col < hw, per_elem, 0.0)

        @pl.when(j != nj - 1)
        def _():
            acc_ref[...] += per_elem
    else:
        acc_ref[...] += per_elem

    # Per-batch-block partial: single cross-lane reduce per batch block.
    @pl.when(j == nj - 1)
    def _():
        out_ref[...] = jnp.sum(acc_ref[...]).reshape(1, 1)


def _default_block_bytes():
    """Generation-aware logits-block byte target (see perf review)."""
    try:
        kind = jax.devices()[0].device_kind.lower()
    except Exception:  # pragma: no cover - conservative fallback
        return 4 << 20
    if "v5" in kind:          # v5e: keep blocks modest (16 MiB scoped default)
        return 2 << 20
    if "7" in kind:           # v7x: 3.2 TB/s/TC -> bigger blocks amortize step overhead
        return 8 << 20
    return 4 << 20            # v6e and default


def cross_entropy_loss(predictions, targets, *, block_bytes=None):
    """predictions: float [B, C, H, W]; targets: int [B, H, W] or [B, 1, H, W]."""
    if targets.ndim == 4:                        # _input_format: squeeze dim=1
        targets = jnp.squeeze(targets, axis=1)

    B, C, H, W = predictions.shape
    HW = H * W

    # Contiguous reshapes only: no transpose, no pad, no extra HBM passes.
    logits = predictions.reshape(B, C, HW)

    # Keep the caller's narrow integer dtype (less HBM traffic, no extra pass).
    if not jnp.issubdtype(targets.dtype, jnp.integer):
        targets = targets.astype(jnp.int32)
    elif jnp.dtype(targets.dtype).itemsize > 4:
        targets = targets.astype(jnp.int32)
    tgt = targets.reshape(B, 1, HW)

    itemsize = jnp.dtype(logits.dtype).itemsize
    tgt_itemsize = jnp.dtype(tgt.dtype).itemsize
    if block_bytes is None:
        block_bytes = _default_block_bytes()

    row_bytes = C * HW * itemsize                # one batch element's logits
    if row_bytes >= block_bytes:
        # Tile the spatial (lane) axis; one batch element per block.
        tb = 1
        tile_hw = max(128, (block_bytes // (C * itemsize)) // 128 * 128)
        tile_hw = min(tile_hw, pl.cdiv(HW, 128) * 128)
    else:
        # Small per-batch rows: tile the batch axis with the full spatial
        # extent so every DMA stays large.
        tile_hw = HW
        tb = min(B, max(1, block_bytes // max(row_bytes, 1)))
    num_i = pl.cdiv(B, tb)
    num_j = pl.cdiv(HW, tile_hw)

    # Explicit scoped-VMEM budget: double-buffered inputs + resident f32
    # accumulator + a handful of row-sized elementwise temporaries (+50%
    # headroom), capped under v7x's 64 MiB physical VMEM.
    logits_block = tb * C * tile_hw * itemsize
    tgt_block = tb * tile_hw * tgt_itemsize
    acc_bytes = tb * tile_hw * 4
    vmem_est = 2 * logits_block + 2 * tgt_block + acc_bytes + 6 * tb * tile_hw * 4
    vmem_limit = int(min(max(int(vmem_est * 1.5), 16 << 20), 56 << 20))

    kernel = functools.partial(_ce_partial_kernel, hw=HW, n_b=B)

    partials = pl.pallas_call(
        kernel,
        out_shape=jax.ShapeDtypeStruct((num_i, 1), jnp.float32),
        grid_spec=pltpu.PrefetchScalarGridSpec(
            num_scalar_prefetch=0,
            grid=(num_i, num_j),
            in_specs=[
                pl.BlockSpec((tb, C, tile_hw), lambda i, j: (i, 0, j)),
                pl.BlockSpec((tb, 1, tile_hw), lambda i, j: (i, 0, j)),
            ],
            out_specs=pl.BlockSpec((1, 1), lambda i, j: (i, 0)),
            scratch_shapes=[pltpu.VMEM((tb, tile_hw), jnp.float32)],
        ),
        compiler_params=pltpu.CompilerParams(
            # Batch blocks are independent (per-block partial outputs) ->
            # "parallel" lets v7x shard them across both TensorCores.
            dimension_semantics=("parallel", "arbitrary"),
            vmem_limit_bytes=vmem_limit,
        ),
    )(logits, tgt)

    rows = B * HW
    # Denominator = all pixels, matching torch.nn.CrossEntropyLoss 'mean'
    # when no target equals ignore_index.
    return (jnp.sum(partials) / jnp.float32(rows)).astype(jnp.float32)


def _reference_loss(predictions, targets):
    """Pure-JAX reference, same semantics as torch CrossEntropyLoss('mean')."""
    if targets.ndim == 4:
        targets = jnp.squeeze(targets, axis=1)
    B, C, H, W = predictions.shape
    x = jnp.transpose(predictions, (0, 2, 3, 1)).reshape(-1, C).astype(jnp.float32)
    t = targets.reshape(-1).astype(jnp.int32)
    logz = jax.nn.logsumexp(x, axis=-1)
    picked = jnp.take_along_axis(x, t[:, None], axis=-1)[:, 0]
    return jnp.mean(logz - picked)


if __name__ == "__main__":
    key = jax.random.PRNGKey(0)

    # Case 1: module-sized input, 4-D targets, default tiling (batch-tiled
    # path, no masks, single grid step).
    k1, k2, key = jax.random.split(key, 3)
    B, C, H, W = 2, 4, 16, 16
    preds1 = jax.random.normal(k1, (B, C, H, W), dtype=jnp.float32)
    tgts1 = jax.random.randint(k2, (B, 1, H, W), 0, C, dtype=jnp.int32)
    loss1 = jax.block_until_ready(cross_entropy_loss(preds1, tgts1))
    ref1 = _reference_loss(preds1, tgts1)
    assert jnp.allclose(loss1, ref1, atol=1e-5, rtol=1e-5), (loss1, ref1)

    # Case 2: spatial-tiled path with a masked column tail (HW % tile != 0).
    k1, k2, key = jax.random.split(key, 3)
    preds2 = jax.random.normal(k1, (2, 4, 18, 18), dtype=jnp.float32)
    tgts2 = jax.random.randint(k2, (2, 18, 18), 0, 4, dtype=jnp.int32)
    loss2 = jax.block_until_ready(
        cross_entropy_loss(preds2, tgts2, block_bytes=2048))
    ref2 = _reference_loss(preds2, tgts2)
    assert jnp.allclose(loss2, ref2, atol=1e-5, rtol=1e-5), (loss2, ref2)

    # Case 3: batch-tiled path with a masked batch tail (B % tb != 0).
    k1, k2, key = jax.random.split(key, 3)
    preds3 = jax.random.normal(k1, (3, 4, 8, 8), dtype=jnp.float32)
    tgts3 = jax.random.randint(k2, (3, 1, 8, 8), 0, 4, dtype=jnp.int32)
    loss3 = jax.block_until_ready(
        cross_entropy_loss(preds3, tgts3, block_bytes=2048))
    ref3 = _reference_loss(preds3, tgts3)
    assert jnp.allclose(loss3, ref3, atol=1e-5, rtol=1e-5), (loss3, ref3)

    print("KERNEL_OK")
</pallas_src>

<mosaic_0001>
module attributes {stable_mosaic.version = 11 : i64} {
  func.func @_ce_partial_kernel(%arg0: i32, %arg1: i32, %arg2: memref<2x4x256xf32, #tpu.memory_space<vmem>>, %arg3: memref<2x1x256xi32, #tpu.memory_space<vmem>>, %arg4: memref<1x1xf32, #tpu.memory_space<vmem>>, %arg5: memref<2x256xf32, #tpu.memory_space<vmem>>) attributes {dimension_semantics = [#tpu.dimension_semantics<parallel>, #tpu.dimension_semantics<arbitrary>], iteration_bounds = array<i64: 1, 1>, scalar_prefetch = 0 : i64, scratch_operands = 1 : i64, tpu.core_type = #tpu.core_type<tc>, window_params = [{transform_indices = @transform_0, window_bounds = array<i64: 2, 4, 256>}, {transform_indices = @transform_1, window_bounds = array<i64: 2, 1, 256>}, {transform_indices = @transform_2, window_bounds = array<i64: 1, 1>}]} {
    %c0_i32 = arith.constant 0 : i32
    %0 = arith.cmpi eq, %arg1, %c0_i32 : i32
    %1 = arith.extui %0 : i1 to i32
    %c0_i32_0 = arith.constant 0 : i32
    %2 = arith.cmpi ne, %1, %c0_i32_0 : i32
    scf.if %2 {
      %cst_35 = arith.constant 0.000000e+00 : f32
      %65 = vector.broadcast %cst_35 : f32 to vector<2x256xf32>
      %c0_36 = arith.constant 0 : index
      %c0_37 = arith.constant 0 : index
      %66 = vector.load %arg5[%c0_36, %c0_37] : memref<2x256xf32, #tpu.memory_space<vmem>>, vector<2x256xf32>
      tpu.vector_store %arg5[%c0_36, %c0_37], %65 {strides = array<i32>} : memref<2x256xf32, #tpu.memory_space<vmem>>, vector<2x256xf32>,
    } else {
    }
    %c0 = arith.constant 0 : index
    %c0_1 = arith.constant 0 : index
    %c0_2 = arith.constant 0 : index
    %3 = vector.load %arg3[%c0, %c0_1, %c0_2] : memref<2x1x256xi32, #tpu.memory_space<vmem>>, vector<2x1x256xi32>
    %4 = vector.shape_cast %3 : vector<2x1x256xi32> to vector<2x256xi32>
    %c0_3 = arith.constant 0 : index
    %c0_4 = arith.constant 0 : index
    %c0_5 = arith.constant 0 : index
    %5 = vector.load %arg2[%c0_3, %c0_4, %c0_5] : memref<2x4x256xf32, #tpu.memory_space<vmem>>, vector<2x1x256xf32>
    %6 = vector.shape_cast %5 : vector<2x1x256xf32> to vector<2x256xf32>
    %c0_i32_6 = arith.constant 0 : i32
    %7 = vector.broadcast %c0_i32_6 : i32 to vector<2x256xi32>
    %8 = arith.cmpi eq, %4, %7 : vector<2x256xi32>
    %cst = arith.constant 0.000000e+00 : f32
    %9 = vector.broadcast %cst : f32 to vector<2x256xf32>
    %10 = arith.select %8, %6, %9 : vector<2x256xi1>, vector<2x256xf32>
    %c0_7 = arith.constant 0 : index
    %c1 = arith.constant 1 : index
    %c0_8 = arith.constant 0 : index
    %11 = vector.load %arg2[%c0_7, %c1, %c0_8] : memref<2x4x256xf32, #tpu.memory_space<vmem>>, vector<2x1x256xf32>
    %12 = vector.shape_cast %11 : vector<2x1x256xf32> to vector<2x256xf32>
    %13 = arith.maximumf %6, %12 : vector<2x256xf32>
    %c1_i32 = arith.constant 1 : i32
    %14 = vector.broadcast %c1_i32 : i32 to vector<2x256xi32>
    %15 = arith.cmpi eq, %4, %14 : vector<2x256xi32>
    %cst_9 = arith.constant 0.000000e+00 : f32
    %16 = vector.broadcast %cst_9 : f32 to vector<2x256xf32>
    %17 = arith.select %15, %12, %16 : vector<2x256xi1>, vector<2x256xf32>
    %18 = arith.addf %10, %17 : vector<2x256xf32>
    %c0_10 = arith.constant 0 : index
    %c2 = arith.constant 2 : index
    %c0_11 = arith.constant 0 : index
    %19 = vector.load %arg2[%c0_10, %c2, %c0_11] : memref<2x4x256xf32, #tpu.memory_space<vmem>>, vector<2x1x256xf32>
    %20 = vector.shape_cast %19 : vector<2x1x256xf32> to vector<2x256xf32>
    %21 = arith.maximumf %13, %20 : vector<2x256xf32>
    %c2_i32 = arith.constant 2 : i32
    %22 = vector.broadcast %c2_i32 : i32 to vector<2x256xi32>
    %23 = arith.cmpi eq, %4, %22 : vector<2x256xi32>
    %cst_12 = arith.constant 0.000000e+00 : f32
    %24 = vector.broadcast %cst_12 : f32 to vector<2x256xf32>
    %25 = arith.select %23, %20, %24 : vector<2x256xi1>, vector<2x256xf32>
    %26 = arith.addf %18, %25 : vector<2x256xf32>
    %c0_13 = arith.constant 0 : index
    %c3 = arith.constant 3 : index
    %c0_14 = arith.constant 0 : index
    %27 = vector.load %arg2[%c0_13, %c3, %c0_14] : memref<2x4x256xf32, #tpu.memory_space<vmem>>, vector<2x1x256xf32>
    %28 = vector.shape_cast %27 : vector<2x1x256xf32> to vector<2x256xf32>
    %29 = arith.maximumf %21, %28 : vector<2x256xf32>
    %c3_i32 = arith.constant 3 : i32
    %30 = vector.broadcast %c3_i32 : i32 to vector<2x256xi32>
    %31 = arith.cmpi eq, %4, %30 : vector<2x256xi32>
    %cst_15 = arith.constant 0.000000e+00 : f32
    %32 = vector.broadcast %cst_15 : f32 to vector<2x256xf32>
    %33 = arith.select %31, %28, %32 : vector<2x256xi1>, vector<2x256xf32>
    %34 = arith.addf %26, %33 : vector<2x256xf32>
    %cst_16 = arith.constant 0.000000e+00 : f32
    %35 = vector.broadcast %cst_16 : f32 to vector<2x256xf32>
    %c0_17 = arith.constant 0 : index
    %c0_18 = arith.constant 0 : index
    %c0_19 = arith.constant 0 : index
    %36 = vector.load %arg2[%c0_17, %c0_18, %c0_19] : memref<2x4x256xf32, #tpu.memory_space<vmem>>, vector<2x1x256xf32>
    %37 = vector.shape_cast %36 : vector<2x1x256xf32> to vector<2x256xf32>
    %38 = arith.subf %37, %29 : vector<2x256xf32>
    %39 = math.exp %38 : vector<2x256xf32>
    %40 = arith.addf %35, %39 : vector<2x256xf32>
    %c0_20 = arith.constant 0 : index
    %c1_21 = arith.constant 1 : index
    %c0_22 = arith.constant 0 : index
    %41 = vector.load %arg2[%c0_20, %c1_21, %c0_22] : memref<2x4x256xf32, #tpu.memory_space<vmem>>, vector<2x1x256xf32>
    %42 = vector.shape_cast %41 : vector<2x1x256xf32> to vector<2x256xf32>
    %43 = arith.subf %42, %29 : vector<2x256xf32>
    %44 = math.exp %43 : vector<2x256xf32>
    %45 = arith.addf %40, %44 : vector<2x256xf32>
    %c0_23 = arith.constant 0 : index
    %c2_24 = arith.constant 2 : index
    %c0_25 = arith.constant 0 : index
    %46 = vector.load %arg2[%c0_23, %c2_24, %c0_25] : memref<2x4x256xf32, #tpu.memory_space<vmem>>, vector<2x1x256xf32>
    %47 = vector.shape_cast %46 : vector<2x1x256xf32> to vector<2x256xf32>
    %48 = arith.subf %47, %29 : vector<2x256xf32>
    %49 = math.exp %48 : vector<2x256xf32>
    %50 = arith.addf %45, %49 : vector<2x256xf32>
    %c0_26 = arith.constant 0 : index
    %c3_27 = arith.constant 3 : index
    %c0_28 = arith.constant 0 : index
    %51 = vector.load %arg2[%c0_26, %c3_27, %c0_28] : memref<2x4x256xf32, #tpu.memory_space<vmem>>, vector<2x1x256xf32>
    %52 = vector.shape_cast %51 : vector<2x1x256xf32> to vector<2x256xf32>
    %53 = arith.subf %52, %29 : vector<2x256xf32>
    %54 = math.exp %53 : vector<2x256xf32>
    %55 = arith.addf %50, %54 : vector<2x256xf32>
    %56 = math.log %55 : vector<2x256xf32>
    %57 = arith.addf %29, %56 : vector<2x256xf32>
    %58 = arith.subf %57, %34 : vector<2x256xf32>
    %c0_29 = arith.constant 0 : index
    %c0_30 = arith.constant 0 : index
    %59 = vector.load %arg5[%c0_29, %c0_30] : memref<2x256xf32, #tpu.memory_space<vmem>>, vector<2x256xf32>
    %60 = arith.addf %59, %58 : vector<2x256xf32>
    %c0_31 = arith.constant 0 : index
    %c0_32 = arith.constant 0 : index
    %61 = vector.load %arg5[%c0_31, %c0_32] : memref<2x256xf32, #tpu.memory_space<vmem>>, vector<2x256xf32>
    tpu.vector_store %arg5[%c0_31, %c0_32], %60 {strides = array<i32>} : memref<2x256xf32, #tpu.memory_space<vmem>>, vector<2x256xf32>,
    %c0_i32_33 = arith.constant 0 : i32
    %62 = arith.cmpi eq, %arg1, %c0_i32_33 : i32
    %63 = arith.extui %62 : i1 to i32
    %c0_i32_34 = arith.constant 0 : i32
    %64 = arith.cmpi ne, %63, %c0_i32_34 : i32
    scf.if %64 {
      %c0_35 = arith.constant 0 : index
      %c0_36 = arith.constant 0 : index
      %65 = vector.load %arg5[%c0_35, %c0_36] : memref<2x256xf32, #tpu.memory_space<vmem>>, vector<2x256xf32>
      %66 = vector.shape_cast %65 : vector<2x256xf32> to vector<1x2x256xf32>
      %cst_37 = arith.constant dense<0.000000e+00> : vector<1xf32>
      %67 = vector.multi_reduction <add>, %66, %cst_37 [1, 2] : vector<1x2x256xf32> to vector<1xf32>
      %68 = vector.shape_cast %67 : vector<1xf32> to vector<1x1x1xf32>
      %69 = vector.extract %68[0, 0, 0] : f32 from vector<1x1x1xf32>
      %70 = vector.broadcast %69 : f32 to vector<1x1xf32>
      %c0_38 = arith.constant 0 : index
      %c0_39 = arith.constant 0 : index
      %71 = vector.load %arg4[%c0_38, %c0_39] : memref<1x1xf32, #tpu.memory_space<vmem>>, vector<1x1xf32>
      tpu.vector_store %arg4[%c0_38, %c0_39], %70 {strides = array<i32>} : memref<1x1xf32, #tpu.memory_space<vmem>>, vector<1x1xf32>,
    } else {
    }
    return
  }
  func.func @transform_0(%arg0: i32, %arg1: i32) -> (i32, i32, i32) {
    %c0_i32 = arith.constant 0 : i32
    %c0_i32_0 = arith.constant 0 : i32
    return %arg0, %c0_i32, %arg1 : i32, i32, i32
  }
  func.func @transform_1(%arg0: i32, %arg1: i32) -> (i32, i32, i32) {
    %c0_i32 = arith.constant 0 : i32
    %c0_i32_0 = arith.constant 0 : i32
    return %arg0, %c0_i32, %arg1 : i32, i32, i32
  }
  func.func @transform_2(%arg0: i32, %arg1: i32) -> (i32, i32) {
    %c0_i32 = arith.constant 0 : i32
    %c0_i32_0 = arith.constant 0 : i32
    return %arg0, %c0_i32 : i32, i32
  }
}

</mosaic_0001>

<bundles_post_ra>
// kernel: tpu_custom_call.1
= control target key start
LH: loop header
LB: loop body
LE: loop exit
PB: predicated region body
PF: predicated region fallthrough
CT: control target
= control target key end

     0   :  { %7 = vsyncpa [#allocation4], 0  ;;  %s352_s0 = inlined_call_operand.hbm [shape: f32[2,4,256], index: 0, kind: input, shape index: {}]   ;;  %s353_s1 = inlined_call_operand.hbm [shape: s32[2,1,256], index: 1, kind: input, shape index: {}]   ;;  %s354_s2 = inlined_call_operand.hbm [shape: f32[1,1], index: 2, kind: output, shape index: {}]  }
   0x1   :  { %8 = vsyncpa [#allocation7], 0 }
   0x2   :  { %9 = vsyncpa [#allocation5], 0  ;;  %s14_s11 = sshll.u32 %s352_s0, 4  ;;  %s296_s12 = smov [#allocation3]   ;;  %s15_s11 = int_to_ptr.hbm [resolvable:$true] %s14_s11 }
   0x3   :  { %s16_s13 = sshll.u32 %s296_s12, 4  ;;  %s27_s16 = sshll.u32 %s353_s1, 4  ;;  %s17_s13 = int_to_ptr.vmem [resolvable:$true] %s16_s13  ;;  %s28_s16 = int_to_ptr.hbm [resolvable:$true] %s27_s16 }
   0x4   :  { %s297_s17 = smov 128   ;;  %s298_s18 = smov 8  }
   0x5   :  { %22 = dma.hbm_to_vmem [thread:$0]  %s15_s11, 256, %s17_s13, [#allocation4], %s297_s17, %s297_s17, %s298_s18  }
   0x6   :  { %s299_s19 = smov [#allocation6]   ;;  %s300_s21 = smov 32  }
   0x7   :  { %s29_s20 = sshll.u32 %s299_s19, 4  ;;  %s301_s22 = smov 2   ;;  %s30_s20 = int_to_ptr.vmem [resolvable:$true] %s29_s20 }
   0x8   :  { %35 = dma.hbm_to_vmem [thread:$0]  %s28_s16, 64, %s30_s20, [#allocation7], %s300_s21, %s300_s21, %s301_s22  }
   0x9   :  { %290 = dma.done.wait [#allocation4], 256  }
   0xa   :  { %291 = vsyncadd [#allocation4], 4294967040 }
   0xb   :  { %292 = dma.done.wait [#allocation7], 64  }
   0xc   :  { %293 = vsyncadd [#allocation7], 4294967232  ;;  %v302_v0 = vmov 0.0   ;;  %v51_v1 = vld [vmem:[#allocation3] ss:$4 sm:$0x3] }
   0xd   :  { %48 = vst [vmem:[#allocation2] sm:$0xf] %v302_v0  ;;  %v53_v2 = vld [vmem:[#allocation3 + $0x8] ss:$4 sm:$0x3]  ;;  %vm154_vm8 = vcmask 1041408  }
   0xe   :  { %v59_v3 = vld [vmem:[#allocation3 + $0x1] ss:$4 sm:$0x3]  ;;  %v61_v4 = vld [vmem:[#allocation3 + $0x9] ss:$4 sm:$0x3] }
   0xf   :  { %v62_v5 = vmax.f32 %v51_v1, %v59_v3  ;;  %v63_v6 = vmax.f32 %v53_v2, %v61_v4  ;;  %v71_v7 = vld [vmem:[#allocation3 + $0x2] ss:$4 sm:$0x3]  ;;  %v73_v8 = vld [vmem:[#allocation3 + $0xa] ss:$4 sm:$0x3] }
  0x10   :  { %v325_v11 = vld [vmem:[#allocation3 + $0x3] ss:$4 sm:$0x3]  ;;  %v327_v12 = vld [vmem:[#allocation3 + $0xb] ss:$4 sm:$0x3] }
  0x11   :  { %v74_v9 = vmax.f32 %v62_v5, %v71_v7  ;;  %v75_v10 = vmax.f32 %v63_v6, %v73_v8  ;;  %v49_v31 = vld [vmem:[#allocation6] sm:$0x3]  ;;  %v50_v33 = vld [vmem:[#allocation6 + $0x2] sm:$0x3]  ;;  %s303_s0 = smov [#allocation8]   ;;  %s177_s25 = sshll.u32 %s354_s2, 4  ;;  %s178_s25 = int_to_ptr.hbm [resolvable:$true] %s177_s25 }
  0x12   :  { %vm54_vm0 = vcmp.eq.s32.totalorder %v49_v31, 0  ;;  %vm64_vm1 = vcmp.eq.s32.totalorder %v49_v31, 1  ;;  %vm55_vm2 = vcmp.eq.s32.totalorder %v50_v33, 0  ;;  %vm65_vm3 = vcmp.eq.s32.totalorder %v50_v33, 1  ;;  %s175_s1 = sshll.u32 %s303_s0, 4  ;;  %s176_s1 = int_to_ptr.vmem [resolvable:$true] %s175_s1 }
  0x13   :  { %v330_v13 = vmax.f32 %v74_v9, %v325_v11  ;;  %v333_v14 = vmax.f32 %v75_v10, %v327_v12  ;;  %v56_v41 = vsel %vm54_vm0, %v51_v1, 0.0  ;;  %v66_v42 = vsel %vm64_vm1, %v59_v3, 0.0 }
  0x14   :  { %v57_v45 = vsel %vm55_vm2, %v53_v2, 0.0  ;;  %v67_v46 = vsel %vm65_vm3, %v61_v4, 0.0  ;;  %vm76_vm4 = vcmp.eq.s32.totalorder %v49_v31, 2  ;;  %vm77_vm5 = vcmp.eq.s32.totalorder %v50_v33, 2  ;;  %v134_v5 = vld [vmem:[#allocation2] sm:$0xf] }
  0x15   :  { %v94_v15 = vsub.f32 %v51_v1, %v330_v13  ;;  %v102_v16 = vsub.f32 %v59_v3, %v330_v13  ;;  %v95_v17 = vsub.f32 %v53_v2, %v333_v14  ;;  %v103_v18 = vsub.f32 %v61_v4, %v333_v14 }
  0x16   :  { %v110_v19 = vsub.f32 %v71_v7, %v330_v13  ;;  %v111_v20 = vsub.f32 %v73_v8, %v333_v14  ;;  %v118_v23 = vsub.f32 %v325_v11, %v330_v13  ;;  %v119_v26 = vsub.f32 %v327_v12, %v333_v14 }
  0x17   :  { %v96_v21 = vmul.f32 1.442695, %v94_v15  ;;  %v104_v22 = vmul.f32 1.442695, %v102_v16  ;;  %v98_v24 = vmul.f32 1.442695, %v95_v17  ;;  %v68_v50 = vadd.f32 %v66_v42, %v56_v41 }
  0x18   :  { %v106_v25 = vmul.f32 1.442695, %v103_v18  ;;  %v112_v27 = vmul.f32 1.442695, %v110_v19  ;;  %v114_v28 = vmul.f32 1.442695, %v111_v20  ;;  %v69_v52 = vadd.f32 %v67_v46, %v57_v45 }
  0x19   :  { %198 = vpow2.f32 %v96_v21  ;;  %v120_v29 = vmul.f32 1.442695, %v118_v23  ;;  %v122_v30 = vmul.f32 1.442695, %v119_v26  ;;  %v78_v53 = vsel %vm76_vm4, %v71_v7, 0.0 }
  0x1a   :  { %200 = vpow2.f32 %v98_v24  ;;  %v79_v54 = vsel %vm77_vm5, %v73_v8, 0.0  ;;  %vm88_vm6 = vcmp.eq.s32.totalorder %v49_v31, 3  ;;  %vm89_vm7 = vcmp.eq.s32.totalorder %v50_v33, 3 }
  0x1b   :  { %202 = vpow2.f32 %v104_v22  ;;  %v80_v55 = vadd.f32 %v78_v53, %v68_v50  ;;  %v81_v56 = vadd.f32 %v79_v54, %v69_v52  ;;  %v90_v57 = vsel %vm88_vm6, %v325_v11, 0.0 }
  0x1c   :  { %204 = vpow2.f32 %v106_v25  ;;  %v91_v58 = vsel %vm89_vm7, %v327_v12, 0.0  ;;  %vm168_vm9 = vcmask 0  }
  0x1d   :  { %206 = vpow2.f32 %v112_v27  ;;  %v92_v61 = vadd.f32 %v90_v57, %v80_v55  ;;  %v93_v63 = vadd.f32 %v91_v58, %v81_v56 }
  0x1e   :  { %208 = vpow2.f32 %v114_v28 }
  0x1f   :  { %v199_v32 = vpop.eup %198  ;;  %210 = vpow2.f32 %v120_v29 }
  0x20   :  { %v201_v34 = vpop.eup %200  ;;  %212 = vpow2.f32 %v122_v30 }
  0x21   :  { %v203_v35 = vpop.eup %202 }
  0x22   :  { %v205_v36 = vpop.eup %204  ;;  %v108_v37 = vadd.f32 %v203_v35, %v199_v32 }
  0x23   :  { %v207_v38 = vpop.eup %206  ;;  %v109_v39 = vadd.f32 %v205_v36, %v201_v34 }
  0x24   :  { %v209_v40 = vpop.eup %208  ;;  %v116_v43 = vadd.f32 %v207_v38, %v108_v37 }
  0x25   :  { %v211_v44 = vpop.eup %210  ;;  %v117_v47 = vadd.f32 %v209_v40, %v109_v39 }
  0x26   :  { %v213_v48 = vpop.eup %212  ;;  %v124_v49 = vadd.f32 %v211_v44, %v116_v43 }
  0x27   :  { %v125_v51 = vadd.f32 %v213_v48, %v117_v47 }
  0x28   :  { %214 = vlog2.f32 %v124_v49 }
  0x29   :  { %216 = vlog2.f32 %v125_v51 }
  0x2e   :  { %v215_v59 = vpop.eup %214 }
  0x2f   :  { %v217_v60 = vpop.eup %216  ;;  %v127_v62 = vmul.f32 0.6931472, %v215_v59 }
  0x30   :  { %v129_v0 = vmul.f32 0.6931472, %v217_v60 }
  0x31   :  { %v130_v1 = vadd.f32 %v127_v62, %v330_v13 }
  0x32   :  { %v131_v2 = vadd.f32 %v129_v0, %v333_v14 }
  0x33   :  { %v132_v3 = vsub.f32 %v130_v1, %v92_v61 }
  0x34   :  { %v133_v4 = vsub.f32 %v131_v2, %v93_v63 }
  0x35   :  { %137 = vst [vmem:[#allocation1] ss:$2 sm:$0xff] %v132_v3 }
  0x36   :  { %139 = vst [vmem:[#allocation1 + $0x1] ss:$2 sm:$0xff] %v133_v4 }
  0x3d   :  { %v140_v6 = vld [vmem:[#allocation1] sm:$0xff] }
  0x3e   :  { %v142_v7 = vadd.f32 %v140_v6, %v134_v5 }
  0x40   :  { %143 = vst [vmem:[#allocation2] sm:$0xf] %v142_v7 }
  0x47   :  { %v147_v8 = vld [vmem:[#allocation2] sm:$0xf] }
  0x48   :  { %149 = vst [vmem:[#allocation1] ss:$4 sm:$0xff] %v147_v8 }
  0x4f   :  { %v150_v9 = vld.sshfl [vmem:[#allocation1] sm:$0xff pattern:$0x73625140]  ;;  %v151_v10 = vld.sshfl [vmem:[#allocation1 + $0x8] sm:$0xff pattern:$0x73625140] }
  0x50   :  { %v155_v11 = vsel %vm154_vm8, %v150_v9, 0.0  ;;  %v156_v12 = vsel %vm154_vm8, %v151_v10, 0.0 }
  0x51   :  { %v157_v15 = vadd.f32 %v156_v12, %v155_v11 }
  0x53   :  { %158 = vadd.xlane.f32.xlu0 %v157_v15 }
  0xc6   :  { %v159_v13 = vpop.xlane.xlu0 %158 }
  0xc7   :  { %v160_v16 = vrot.slane %v159_v13, 4 }
  0xc9   :  { %v161_v14 = vadd.f32 %v160_v16, %v159_v13 }
  0xcb   :  { %v162_v17 = vrot.slane %v161_v14, 2 }
  0xcd   :  { %v163_v18 = vadd.f32 %v162_v17, %v161_v14 }
  0xcf   :  { %v164_v19 = vrot.slane %v163_v18, 1 }
  0xd1   :  { %v165_v20 = vadd.f32 %v164_v19, %v163_v18 }
  0xd3   :  { %188 = vpush %v165_v20 }
 0x104   :  { %s189_s26 = spop %188 }
 0x105   :  { %v167_v21 = vstv %s189_s26 }
 0x106   :  { %169 = vst.msk [vmem:[#allocation8] sm:$0x1] %vm168_vm9, %v167_v21 }
 0x107   :  { %180 = dma.vmem_to_hbm [thread:$0]  %s176_s1, 16, %s178_s25, [#allocation5]  }
 0x108   :  { %294 = dma.done.wait [#allocation5], 16  }
 0x109   :  { %295 = vsyncadd [#allocation5], 4294967280 }
 0x10a   :  { %185 = vsyncpa [#allocation4], 1 }
 0x10b   :  { %186 = vsyncpa [#allocation7], 1 }
 0x10c   :  { %187 = vsyncpa [#allocation5], 1 }

</bundles_post_ra>
